<compile_context>
chip_gen: v6e
topology: v6e:2x2x1
jax: 0.10.0
libtpu: 0.0.40
codegen_flags: <defaults>
</compile_context>

<pallas_src>
import jax
import jax.numpy as jnp
from jax.experimental import pallas as pl
from jax.experimental.pallas import tpu as pltpu


def _round_up(n, m):
    return ((n + m - 1) // m) * m


def _make_kernel(C, K, Wp, N):
    """Fused in-VMEM im2col + conv matmul + LSTM gates, lane-dense layout."""

    def kernel(xp_ref, hp_ref, w_ref, b_ref, c_ref, out_ref):
        # xp_ref, hp_ref : (C, L)       zero-padded inputs, flattened (Hp*Wp)+tail
        # w_ref          : (4C, K*K*2C) conv weight, contraction order (ky, kx, ci)
        # b_ref          : (4C, 1)      conv bias
        # c_ref          : (C, N)       previous cell state, flattened (H, Wp)+tail
        # out_ref        : (2C, N)      rows [0:C] = h_new, rows [C:2C] = c_new
        #
        # Build the im2col operand in VMEM from K*K static lane-shifted slices
        # (replaces the old HBM-materialized patches array).
        taps = []
        for ky in range(K):
            for kx in range(K):
                off = ky * Wp + kx
                taps.append(xp_ref[:, off:off + N])   # x channels of tap (ky,kx)
                taps.append(hp_ref[:, off:off + N])   # h channels of tap (ky,kx)
        patches = jnp.concatenate(taps, axis=0)        # (K*K*2C, N)

        # Single MXU matmul, f32 accumulation regardless of operand dtype.
        acc = jnp.dot(w_ref[...], patches, preferred_element_type=jnp.float32)
        acc = acc + b_ref[...].astype(jnp.float32)      # (4C, N)

        # Collapsed activations: one sigmoid over i/f/o rows, one tanh for g.
        sig = jax.nn.sigmoid(acc[:3 * C, :])
        g = jnp.tanh(acc[3 * C:, :])
        i_g = sig[0 * C:1 * C, :]
        f_g = sig[1 * C:2 * C, :]
        o_g = sig[2 * C:3 * C, :]

        c_prev = c_ref[...]                             # f32 recurrent state
        c_new = f_g * c_prev + i_g * g
        h_new = o_g * jnp.tanh(c_new)

        # Fused, lane-dense, full-sublane store (one writeback DMA per step).
        out_ref[...] = jnp.concatenate([h_new, c_new], axis=0).astype(out_ref.dtype)

    return kernel


def conv_lstm_cell(x, h, c, weight, bias, *, matmul_dtype=jnp.bfloat16):
    """ConvLSTM cell forward (NCHW, matches the PyTorch module).

    x, h, c : (B, C, H, W) float32
    weight  : (4C, 2C, K, K) float32 (PyTorch nn.Conv2d layout)
    bias    : (4C,) float32
    matmul_dtype : dtype of the MXU operands (x/h slabs and weight).  bf16 is
        the recommended setting on v5e/v6e/v7x; gate math and the cell state
        always stay f32.
    Returns (h_new, c_new), each (B, C, H, W) float32.
    """
    B, C, H, W = x.shape
    C4, C2, K, K2 = weight.shape
    assert C2 == 2 * C and C4 == 4 * C and K == K2, "weight shape mismatch"
    p = K // 2
    Hp, Wp = H + 2 * p, W + 2 * p
    KK2C = K * K * 2 * C

    # Flattened output column index q = y*Wp + x (x < W valid, rest junk).
    N = _round_up(H * Wp, 128)                    # lane-dense output width
    L = _round_up(N + 2 * p * Wp + 2 * p, 128)    # input slab width (covers all taps)

    # TODO(synk): for very large H*W, tile the flattened spatial axis with a
    # halo (pl.Element-indexed BlockSpec or manual pl.ANY + make_async_copy)
    # instead of one whole-image block per batch; and for sequence use, keep
    # h/c resident in this padded-flat layout across timesteps.
    def prep_input(a):
        # (B, C, H, W) -> (B, C, L): spatial zero-pad, flatten (Hp, Wp), tail-pad.
        a = jnp.pad(a, ((0, 0), (0, 0), (p, p), (p, p)))
        a = a.reshape(B, C, Hp * Wp)
        a = jnp.pad(a, ((0, 0), (0, 0), (0, L - Hp * Wp)))
        return a.astype(matmul_dtype)

    xp = prep_input(x)
    hp = prep_input(h)

    # Cell state padded along W so its columns line up with q = y*Wp + x.
    # Stays f32: the recurrent state is never re-quantized.
    c_flat = jnp.pad(c, ((0, 0), (0, 0), (0, 0), (0, Wp - W))).reshape(B, C, H * Wp)
    c_flat = jnp.pad(c_flat, ((0, 0), (0, 0), (0, N - H * Wp)))

    # Tiny one-time weight re-layout: (4C, 2C, K, K) -> (4C, (ky, kx, ci)).
    w_mat = weight.transpose(0, 2, 3, 1).reshape(4 * C, KK2C).astype(matmul_dtype)
    b_mat = bias.reshape(4 * C, 1)

    kernel = _make_kernel(C, K, Wp, N)

    grid_spec = pltpu.PrefetchScalarGridSpec(
        num_scalar_prefetch=0,
        grid=(B,),
        in_specs=[
            pl.BlockSpec((pl.Squeezed(), C, L), lambda b: (b, 0, 0)),       # x (padded)
            pl.BlockSpec((pl.Squeezed(), C, L), lambda b: (b, 0, 0)),       # h (padded)
            pl.BlockSpec((4 * C, KK2C), lambda b: (0, 0)),                  # weight (resident)
            pl.BlockSpec((4 * C, 1), lambda b: (0, 0)),                     # bias (resident)
            pl.BlockSpec((pl.Squeezed(), C, N), lambda b: (b, 0, 0)),       # c_prev
        ],
        out_specs=pl.BlockSpec((pl.Squeezed(), 2 * C, N), lambda b: (b, 0, 0)),
    )

    out = pl.pallas_call(
        kernel,
        out_shape=jax.ShapeDtypeStruct((B, 2 * C, N), jnp.float32),
        grid_spec=grid_spec,
        compiler_params=pltpu.CompilerParams(
            dimension_semantics=("parallel",)),
    )(xp, hp, w_mat, b_mat, c_flat)

    # Drop junk columns (q >= H*Wp, or q % Wp >= W) and split fused h / c.
    out = out[:, :, :H * Wp].reshape(B, 2 * C, H, Wp)[:, :, :, :W]
    h_new = out[:, :C]
    c_new = out[:, C:]
    return h_new, c_new


def conv_lstm_cell_ref(x, h, c, weight, bias):
    """Pure-JAX reference mirroring the PyTorch forward (NCHW)."""
    comb = jnp.concatenate([x, h], axis=1)
    conv = jax.lax.conv_general_dilated(
        comb, weight, window_strides=(1, 1), padding="SAME",
        dimension_numbers=("NCHW", "OIHW", "NCHW"),
        precision=jax.lax.Precision.HIGHEST)
    conv = conv + bias[None, :, None, None]
    C = h.shape[1]
    cc_i, cc_f, cc_o, cc_g = jnp.split(conv, 4, axis=1)
    i = jax.nn.sigmoid(cc_i)
    f = jax.nn.sigmoid(cc_f)
    o = jax.nn.sigmoid(cc_o)
    g = jnp.tanh(cc_g)
    c_new = f * c + i * g
    h_new = o * jnp.tanh(c_new)
    return h_new, c_new


if __name__ == "__main__":
    # ConvLSTMCell(channels=4, kernel_size=3); PyTorch NCHW x: (2, 4, 16, 16).
    B, C, H, W, K = 2, 4, 16, 16, 3

    key = jax.random.PRNGKey(0)
    kx, kh, kc, kw, kb = jax.random.split(key, 5)

    x = jax.random.normal(kx, (B, C, H, W), dtype=jnp.float32)
    h = jax.random.normal(kh, (B, C, H, W), dtype=jnp.float32)
    c = jax.random.normal(kc, (B, C, H, W), dtype=jnp.float32)

    # Deterministic synthetic params, same shapes as nn.Conv2d(2C, 4C, K).
    fan_in = 2 * C * K * K
    bound = 1.0 / (fan_in ** 0.5)
    weight = jax.random.uniform(kw, (4 * C, 2 * C, K, K), jnp.float32,
                                minval=-bound, maxval=bound)
    bias = jax.random.uniform(kb, (4 * C,), jnp.float32,
                              minval=-bound, maxval=bound)

    h_ref, c_ref = conv_lstm_cell_ref(x, h, c, weight, bias)

    # f32 MXU operands: tight-tolerance correctness check.
    h32, c32 = conv_lstm_cell(x, h, c, weight, bias, matmul_dtype=jnp.float32)
    jax.block_until_ready((h32, c32))
    assert jnp.allclose(h32, h_ref, atol=1e-4, rtol=1e-4), "h mismatch (f32)"
    assert jnp.allclose(c32, c_ref, atol=1e-4, rtol=1e-4), "c mismatch (f32)"

    # bf16 MXU operands (recommended perf config on v5e/v6e/v7x): looser tol.
    hbf, cbf = conv_lstm_cell(x, h, c, weight, bias, matmul_dtype=jnp.bfloat16)
    jax.block_until_ready((hbf, cbf))
    assert jnp.allclose(hbf, h_ref, atol=2e-2, rtol=2e-2), "h mismatch (bf16)"
    assert jnp.allclose(cbf, c_ref, atol=2e-2, rtol=2e-2), "c mismatch (bf16)"

    print("KERNEL_OK")
</pallas_src>

<mosaic_0001>
module attributes {stable_mosaic.version = 11 : i64} {
  func.func @kernel(%arg0: i32, %arg1: memref<1x4x512xf32, #tpu.memory_space<vmem>>, %arg2: memref<1x4x512xf32, #tpu.memory_space<vmem>>, %arg3: memref<16x72xf32, #tpu.memory_space<vmem>>, %arg4: memref<16x1xf32, #tpu.memory_space<vmem>>, %arg5: memref<1x4x384xf32, #tpu.memory_space<vmem>>, %arg6: memref<1x8x384xf32, #tpu.memory_space<vmem>>) attributes {dimension_semantics = [#tpu.dimension_semantics<parallel>], iteration_bounds = array<i64: 2>, scalar_prefetch = 0 : i64, scratch_operands = 0 : i64, tpu.core_type = #tpu.core_type<tc>, window_params = [{transform_indices = @transform_0, window_bounds = array<i64: 1, 4, 512>}, {transform_indices = @transform_1, window_bounds = array<i64: 1, 4, 512>}, {pipeline_mode = #tpu.pipeline_mode<synchronous>, transform_indices = @transform_2, window_bounds = array<i64: 16, 72>}, {pipeline_mode = #tpu.pipeline_mode<synchronous>, transform_indices = @transform_3, window_bounds = array<i64: 16, 1>}, {transform_indices = @transform_4, window_bounds = array<i64: 1, 4, 384>}, {transform_indices = @transform_5, window_bounds = array<i64: 1, 8, 384>}]} {
    %c0 = arith.constant 0 : index
    %c0_0 = arith.constant 0 : index
    %c0_1 = arith.constant 0 : index
    %0 = vector.load %arg1[%c0, %c0_0, %c0_1] : memref<1x4x512xf32, #tpu.memory_space<vmem>>, vector<1x4x384xf32>
    %1 = vector.shape_cast %0 : vector<1x4x384xf32> to vector<4x384xf32>
    %c0_2 = arith.constant 0 : index
    %c0_3 = arith.constant 0 : index
    %c0_4 = arith.constant 0 : index
    %2 = vector.load %arg2[%c0_2, %c0_3, %c0_4] : memref<1x4x512xf32, #tpu.memory_space<vmem>>, vector<1x4x384xf32>
    %3 = vector.shape_cast %2 : vector<1x4x384xf32> to vector<4x384xf32>
    %c0_5 = arith.constant 0 : index
    %c0_6 = arith.constant 0 : index
    %c1 = arith.constant 1 : index
    %4 = vector.load %arg1[%c0_5, %c0_6, %c1] : memref<1x4x512xf32, #tpu.memory_space<vmem>>, vector<1x4x384xf32>
    %5 = vector.shape_cast %4 : vector<1x4x384xf32> to vector<4x384xf32>
    %c0_7 = arith.constant 0 : index
    %c0_8 = arith.constant 0 : index
    %c1_9 = arith.constant 1 : index
    %6 = vector.load %arg2[%c0_7, %c0_8, %c1_9] : memref<1x4x512xf32, #tpu.memory_space<vmem>>, vector<1x4x384xf32>
    %7 = vector.shape_cast %6 : vector<1x4x384xf32> to vector<4x384xf32>
    %c0_10 = arith.constant 0 : index
    %c0_11 = arith.constant 0 : index
    %c2 = arith.constant 2 : index
    %8 = vector.load %arg1[%c0_10, %c0_11, %c2] : memref<1x4x512xf32, #tpu.memory_space<vmem>>, vector<1x4x384xf32>
    %9 = vector.shape_cast %8 : vector<1x4x384xf32> to vector<4x384xf32>
    %c0_12 = arith.constant 0 : index
    %c0_13 = arith.constant 0 : index
    %c2_14 = arith.constant 2 : index
    %10 = vector.load %arg2[%c0_12, %c0_13, %c2_14] : memref<1x4x512xf32, #tpu.memory_space<vmem>>, vector<1x4x384xf32>
    %11 = vector.shape_cast %10 : vector<1x4x384xf32> to vector<4x384xf32>
    %c0_15 = arith.constant 0 : index
    %c0_16 = arith.constant 0 : index
    %c18 = arith.constant 18 : index
    %12 = vector.load %arg1[%c0_15, %c0_16, %c18] : memref<1x4x512xf32, #tpu.memory_space<vmem>>, vector<1x4x384xf32>
    %13 = vector.shape_cast %12 : vector<1x4x384xf32> to vector<4x384xf32>
    %c0_17 = arith.constant 0 : index
    %c0_18 = arith.constant 0 : index
    %c18_19 = arith.constant 18 : index
    %14 = vector.load %arg2[%c0_17, %c0_18, %c18_19] : memref<1x4x512xf32, #tpu.memory_space<vmem>>, vector<1x4x384xf32>
    %15 = vector.shape_cast %14 : vector<1x4x384xf32> to vector<4x384xf32>
    %c0_20 = arith.constant 0 : index
    %c0_21 = arith.constant 0 : index
    %c19 = arith.constant 19 : index
    %16 = vector.load %arg1[%c0_20, %c0_21, %c19] : memref<1x4x512xf32, #tpu.memory_space<vmem>>, vector<1x4x384xf32>
    %17 = vector.shape_cast %16 : vector<1x4x384xf32> to vector<4x384xf32>
    %c0_22 = arith.constant 0 : index
    %c0_23 = arith.constant 0 : index
    %c19_24 = arith.constant 19 : index
    %18 = vector.load %arg2[%c0_22, %c0_23, %c19_24] : memref<1x4x512xf32, #tpu.memory_space<vmem>>, vector<1x4x384xf32>
    %19 = vector.shape_cast %18 : vector<1x4x384xf32> to vector<4x384xf32>
    %c0_25 = arith.constant 0 : index
    %c0_26 = arith.constant 0 : index
    %c20 = arith.constant 20 : index
    %20 = vector.load %arg1[%c0_25, %c0_26, %c20] : memref<1x4x512xf32, #tpu.memory_space<vmem>>, vector<1x4x384xf32>
    %21 = vector.shape_cast %20 : vector<1x4x384xf32> to vector<4x384xf32>
    %c0_27 = arith.constant 0 : index
    %c0_28 = arith.constant 0 : index
    %c20_29 = arith.constant 20 : index
    %22 = vector.load %arg2[%c0_27, %c0_28, %c20_29] : memref<1x4x512xf32, #tpu.memory_space<vmem>>, vector<1x4x384xf32>
    %23 = vector.shape_cast %22 : vector<1x4x384xf32> to vector<4x384xf32>
    %c0_30 = arith.constant 0 : index
    %c0_31 = arith.constant 0 : index
    %c36 = arith.constant 36 : index
    %24 = vector.load %arg1[%c0_30, %c0_31, %c36] : memref<1x4x512xf32, #tpu.memory_space<vmem>>, vector<1x4x384xf32>
    %25 = vector.shape_cast %24 : vector<1x4x384xf32> to vector<4x384xf32>
    %c0_32 = arith.constant 0 : index
    %c0_33 = arith.constant 0 : index
    %c36_34 = arith.constant 36 : index
    %26 = vector.load %arg2[%c0_32, %c0_33, %c36_34] : memref<1x4x512xf32, #tpu.memory_space<vmem>>, vector<1x4x384xf32>
    %27 = vector.shape_cast %26 : vector<1x4x384xf32> to vector<4x384xf32>
    %c0_35 = arith.constant 0 : index
    %c0_36 = arith.constant 0 : index
    %c37 = arith.constant 37 : index
    %28 = vector.load %arg1[%c0_35, %c0_36, %c37] : memref<1x4x512xf32, #tpu.memory_space<vmem>>, vector<1x4x384xf32>
    %29 = vector.shape_cast %28 : vector<1x4x384xf32> to vector<4x384xf32>
    %c0_37 = arith.constant 0 : index
    %c0_38 = arith.constant 0 : index
    %c37_39 = arith.constant 37 : index
    %30 = vector.load %arg2[%c0_37, %c0_38, %c37_39] : memref<1x4x512xf32, #tpu.memory_space<vmem>>, vector<1x4x384xf32>
    %31 = vector.shape_cast %30 : vector<1x4x384xf32> to vector<4x384xf32>
    %c0_40 = arith.constant 0 : index
    %c0_41 = arith.constant 0 : index
    %c38 = arith.constant 38 : index
    %32 = vector.load %arg1[%c0_40, %c0_41, %c38] : memref<1x4x512xf32, #tpu.memory_space<vmem>>, vector<1x4x384xf32>
    %33 = vector.shape_cast %32 : vector<1x4x384xf32> to vector<4x384xf32>
    %c0_42 = arith.constant 0 : index
    %c0_43 = arith.constant 0 : index
    %c38_44 = arith.constant 38 : index
    %34 = vector.load %arg2[%c0_42, %c0_43, %c38_44] : memref<1x4x512xf32, #tpu.memory_space<vmem>>, vector<1x4x384xf32>
    %35 = vector.shape_cast %34 : vector<1x4x384xf32> to vector<4x384xf32>
    %36 = tpu.concatenate %1, %3, %5, %7, %9, %11, %13, %15, %17, %19, %21, %23, %25, %27, %29, %31 in 0 : vector<4x384xf32>, vector<4x384xf32>, vector<4x384xf32>, vector<4x384xf32>, vector<4x384xf32>, vector<4x384xf32>, vector<4x384xf32>, vector<4x384xf32>, vector<4x384xf32>, vector<4x384xf32>, vector<4x384xf32>, vector<4x384xf32>, vector<4x384xf32>, vector<4x384xf32>, vector<4x384xf32>, vector<4x384xf32> -> vector<64x384xf32>
    %37 = tpu.concatenate %33, %35 in 0 : vector<4x384xf32>, vector<4x384xf32> -> vector<8x384xf32>
    %38 = tpu.concatenate %36, %37 in 0 : vector<64x384xf32>, vector<8x384xf32> -> vector<72x384xf32>
    %c0_45 = arith.constant 0 : index
    %c0_46 = arith.constant 0 : index
    %39 = vector.load %arg3[%c0_45, %c0_46] : memref<16x72xf32, #tpu.memory_space<vmem>>, vector<16x72xf32>
    %cst = arith.constant dense<0.000000e+00> : vector<16x384xf32>
    %40 = tpu.matmul %39, %38, %cst {dimension_numbers = #tpu.dot_dimension_numbers<[1], [0], [0], [1], [0, 0, 1, 1], [], []>} : vector<16x72xf32>, vector<72x384xf32>, vector<16x384xf32> -> vector<16x384xf32>
    %c0_47 = arith.constant 0 : index
    %c0_48 = arith.constant 0 : index
    %41 = vector.load %arg4[%c0_47, %c0_48] : memref<16x1xf32, #tpu.memory_space<vmem>>, vector<16x1xf32>
    %42 = vector.broadcast %41 : vector<16x1xf32> to vector<16x384xf32>
    %43 = arith.addf %40, %42 : vector<16x384xf32>
    %44 = vector.extract_strided_slice %43 {offsets = [0, 0], sizes = [12, 384], strides = [1, 1]} : vector<16x384xf32> to vector<12x384xf32>
    %45 = arith.negf %44 : vector<12x384xf32>
    %46 = math.exp %45 : vector<12x384xf32>
    %cst_49 = arith.constant 1.000000e+00 : f32
    %47 = vector.broadcast %cst_49 : f32 to vector<12x384xf32>
    %48 = arith.addf %47, %46 : vector<12x384xf32>
    %49 = arith.divf %47, %48 : vector<12x384xf32>
    %50 = vector.extract_strided_slice %43 {offsets = [12, 0], sizes = [4, 384], strides = [1, 1]} : vector<16x384xf32> to vector<4x384xf32>
    %51 = math.tanh %50 : vector<4x384xf32>
    %52 = vector.extract_strided_slice %49 {offsets = [0, 0], sizes = [4, 384], strides = [1, 1]} : vector<12x384xf32> to vector<4x384xf32>
    %53 = vector.extract_strided_slice %49 {offsets = [4, 0], sizes = [4, 384], strides = [1, 1]} : vector<12x384xf32> to vector<4x384xf32>
    %54 = vector.extract_strided_slice %49 {offsets = [8, 0], sizes = [4, 384], strides = [1, 1]} : vector<12x384xf32> to vector<4x384xf32>
    %c0_50 = arith.constant 0 : index
    %c0_51 = arith.constant 0 : index
    %c0_52 = arith.constant 0 : index
    %55 = vector.load %arg5[%c0_50, %c0_51, %c0_52] : memref<1x4x384xf32, #tpu.memory_space<vmem>>, vector<1x4x384xf32>
    %56 = vector.shape_cast %55 : vector<1x4x384xf32> to vector<4x384xf32>
    %57 = arith.mulf %53, %56 : vector<4x384xf32>
    %58 = arith.mulf %52, %51 : vector<4x384xf32>
    %59 = arith.addf %57, %58 : vector<4x384xf32>
    %60 = math.tanh %59 : vector<4x384xf32>
    %61 = arith.mulf %54, %60 : vector<4x384xf32>
    %62 = tpu.concatenate %61, %59 in 0 : vector<4x384xf32>, vector<4x384xf32> -> vector<8x384xf32>
    %c0_53 = arith.constant 0 : index
    %c0_54 = arith.constant 0 : index
    %c0_55 = arith.constant 0 : index
    %63 = vector.load %arg6[%c0_53, %c0_54, %c0_55] : memref<1x8x384xf32, #tpu.memory_space<vmem>>, vector<1x8x384xf32>
    %64 = vector.shape_cast %63 : vector<1x8x384xf32> to vector<8x384xf32>
    %65 = vector.shape_cast %62 : vector<8x384xf32> to vector<1x8x384xf32>
    tpu.vector_store %arg6[%c0_53, %c0_54, %c0_55], %65 {strides = array<i32>} : memref<1x8x384xf32, #tpu.memory_space<vmem>>, vector<1x8x384xf32>,
    return
  }
  func.func @transform_0(%arg0: i32) -> (i32, i32, i32) {
    %c0_i32 = arith.constant 0 : i32
    %c0_i32_0 = arith.constant 0 : i32
    %c0_i32_1 = arith.constant 0 : i32
    return %arg0, %c0_i32, %c0_i32_0 : i32, i32, i32
  }
  func.func @transform_1(%arg0: i32) -> (i32, i32, i32) {
    %c0_i32 = arith.constant 0 : i32
    %c0_i32_0 = arith.constant 0 : i32
    %c0_i32_1 = arith.constant 0 : i32
    return %arg0, %c0_i32, %c0_i32_0 : i32, i32, i32
  }
  func.func @transform_2(%arg0: i32) -> (i32, i32) {
    %c0_i32 = arith.constant 0 : i32
    %c0_i32_0 = arith.constant 0 : i32
    %c0_i32_1 = arith.constant 0 : i32
    return %c0_i32, %c0_i32_0 : i32, i32
  }
  func.func @transform_3(%arg0: i32) -> (i32, i32) {
    %c0_i32 = arith.constant 0 : i32
    %c0_i32_0 = arith.constant 0 : i32
    %c0_i32_1 = arith.constant 0 : i32
    return %c0_i32, %c0_i32_0 : i32, i32
  }
  func.func @transform_4(%arg0: i32) -> (i32, i32, i32) {
    %c0_i32 = arith.constant 0 : i32
    %c0_i32_0 = arith.constant 0 : i32
    %c0_i32_1 = arith.constant 0 : i32
    return %arg0, %c0_i32, %c0_i32_0 : i32, i32, i32
  }
  func.func @transform_5(%arg0: i32) -> (i32, i32, i32) {
    %c0_i32 = arith.constant 0 : i32
    %c0_i32_0 = arith.constant 0 : i32
    %c0_i32_1 = arith.constant 0 : i32
    return %arg0, %c0_i32, %c0_i32_0 : i32, i32, i32
  }
}

</mosaic_0001>

<bundles_post_ra>
// kernel: tpu_custom_call.1
= control target key start
LH: loop header
LB: loop body
LE: loop exit
PB: predicated region body
PF: predicated region fallthrough
CT: control target
= control target key end

     0   :  { %s1781_s0 = inlined_call_operand.hbm [shape: f32[2,4,512], index: 0, kind: input, shape index: {}]   ;;  %s1782_s1 = inlined_call_operand.hbm [shape: f32[2,4,512], index: 1, kind: input, shape index: {}]   ;;  %s1783_s2 = inlined_call_operand.hbm [shape: f32[16,72], index: 2, kind: input, shape index: {}]   ;;  %s1784_s3 = inlined_call_operand.vmem [shape: f32[16,1], index: 3, kind: input, shape index: {}]   ;;  %s1785_s4 = inlined_call_operand.vmem [shape: f32[2,4,384], index: 4, kind: input, shape index: {}]   ;;  %s1786_s5 = inlined_call_operand.hbm [shape: f32[2,8,384], index: 5, kind: output, shape index: {}]  }
   0x1   :  { %1791 = sst [smem:[#allocation14_spill]] %s1783_s2 }
   0x2   :  { %10 = vsyncpa [#allocation3], 0 }
   0x3   :  { %12 = vsyncpa [#allocation3 + $0x1], 0 }
   0x4   :  { %13 = vsyncpa [#allocation6], 0 }
   0x5   :  { %15 = vsyncpa [#allocation6 + $0x1], 0 }
   0x6   :  { %16 = vsyncpa [#allocation4], 0 }
   0x7   :  { %18 = vsyncpa [#allocation4 + $0x1], 0  ;;  %s1376_s18 = smov 0   ;;  %s1378_s19 = smov 0  }
   0x8   :  { %s1380_s20 = smov 0   ;;  %s1382_s21 = smov 0  }
   0x9 LB: > { %s1397_s22 = sadd.s32 4294967295, %s1328_s21   ;;  %s990_s23 = sadd.s32 4294967294, %s1328_s21   ;;  %s1328_s21 = sphi %s1382_s21, %s1812_s21   ;;  %s1324_s20 = sphi %s1380_s20, %s1811_s20   ;;  %s1320_s19 = sphi %s1378_s19, %s1810_s19   ;;  %s1316_s18 = sphi %s1376_s18, %s1809_s18  }
   0xa   : > { %p44_p0 = scmp.ne.s32.totalorder %s1320_s19, %s1316_s18  ;;  %p1787_p1 = scmp.eq.s32.totalorder %s1397_s22, 0 }
   0xb   : > { %p168_p3 = scmp.eq.s32.totalorder %s990_s23, 1  ;;  %p991_p5 = scmp.ge.s32.totalorder %s1328_s21, 1 }
   0xc   : > { %p1406_p4 = por %p1787_p1, %p44_p0  ;;  %p175_p7 = scmp.lt.s32.totalorder %s1328_s21, 3 }
   0xd   : > { %p1411_p6 = por %p168_p3, %p44_p0  ;;  %s1330_s27 = smov [#allocation7]  }
   0xe   : > { %s1792_s24 = scalar_select %p1406_p4, 1, 0 }
   0xf   : > { %s1793_s25 = scalar_select %p1411_p6, 1, 0 }
  0x10   : > { %p1416_p8 = pnand %p991_p5, %p175_p7  ;;  %s187_s28 = sshll.u32 %s1330_s27, 4  ;;  %s188_s28 = int_to_ptr.vmem [resolvable:$true] %s187_s28 }
  0x11   : > { %s1430_s30 = sadd.s32 1, %s1328_s21   ;;  %s31_s6 = sadd.s32 1, %s1324_s20 }
  0x12   : > { %s1794_s26 = scalar_select %p1416_p8, 1, 0 }
  0x13   : > { %p1065_p9 = pneg %p1416_p8  ;;  %s28_s7 = ssub.s32 %s1328_s21, %s1430_s30 }
  0x14   : > { %s1185_s8 = scalar_lea.vmem %s188_s28, 256  ;;  %p1193_p5 = scmp.lt.s32.totalorder %s188_s28, %s188_s28 }
  0x15   : > { %p1425_p11 = pnand %p1065_p9, %p1787_p1  ;;  %p1186_p13 = scmp.ne.s32.totalorder %s188_s28, %s1185_s8 }
  0x16   : > { %p1194_p7 = scmp.lt.s32.totalorder %s1185_s8, %s1185_s8 }
  0x17   : > { %p1176_p12 = pneg %p1425_p11 }
  0x18   : > { %p1195_p10 = por %p1194_p7, %p1193_p5 }
  0x19   : > { %p1188_p0 = pnand %p1186_p13, %p1176_p12 }
  0x1b   : > { %p1189_p3 = pneg %p1188_p0 }
  0x1d   : > { %p1196_p2 = pnand %p1195_p10, %p1189_p3 }
  0x1f   : > { %1199 = shalt.err (!%p1196_p2)
}
  0x20   : > { %s1331_s9 = smov 128   ;;  %s1332_s10 = smov 8  }
  0x21   : > { %s1796_s2 = sld [smem:[#allocation14_spill]]  ;;  %p29_p9 = scmp.eq.s32.totalorder %s28_s7, 0 }
  0x22   : > { %p38_p12 = scmp.ne.s32.totalorder %s1324_s20, %s1320_s19  ;;  %p39_p10 = scmp.eq.s32.totalorder %s1328_s21, 0 }
  0x23   : > { %p1081_p2 = scmp.lt.s32.totalorder %s1328_s21, 2  ;;  %p1798_p0 = scmp.eq.s32.totalorder %s1397_s22, 1 }
  0x24   : > { %s1447_s13 = scalar_select %p29_p9, %s1324_s20, %s31_s6  }
  0x25   : > { %p40_p13 = por %p39_p10, %p38_p12  ;;  %p1451_p3 = por %p1798_p0, %p38_p12 }
  0x26   : > { %1797 = sst [smem:[#allocation13_spill]] %s1447_s13  ;;  %s204_s15 = sand.u32 1, %s1324_s20  }
  0x27   : > { %1068 = dma.hbm_to_vmem [thread:$0]  (!%p1425_p11), %s1796_s2, 256, %s188_s28, [#allocation6], %s1331_s9, %s1331_s9, %s1332_s10  }
  0x28   : > { %s1799_s14 = scalar_select %p1451_p3, 1, 0 }
  0x29   : > { %s1018_s16 = sshll.u32 %s1328_s21, 8  ;;  %s1457_s17 = sshll.u32 %s204_s15, 4 }
  0x2a   : > { %s1462_s28 = scalar_lea.hbm %s1781_s0, %s1018_s16  ;;  %s208_s29 = scalar_lea.vmem [#allocation2], %s1457_s17 }
  0x2b   : > { %s216_s6 = sshll.u32 %s208_s29, 4  ;;  %p1465_p11 = pnand %p1081_p2, %p40_p13  ;;  %s217_s6 = int_to_ptr.vmem [resolvable:$true] %s216_s6 }
  0x2c   : > { %s1472_s10 = scalar_lea.hbm %s1782_s1, %s1018_s16  ;;  %s205_s11 = scalar_lea.sflag [#allocation3], %s204_s15 }
  0x2d   : > { %s1200_s12 = scalar_lea.hbm %s1462_s28, 256  ;;  %p1202_p7 = pneg %p1465_p11 }
  0x2e   : > { %p1201_p5 = scmp.ne.s32.totalorder %s1462_s28, %s1200_s12  ;;  %s1205_s29 = scalar_lea.hbm %s1781_s0, 512 }
  0x2f   : > { %p1206_p10 = scmp.lt.s32.totalorder %s1462_s28, %s1781_s0  ;;  %p1207_p2 = scmp.lt.s32.totalorder %s1205_s29, %s1200_s12 }
  0x30   : > { %p1203_p9 = pnand %p1202_p7, %p1201_p5 }
  0x31   : > { %p1208_p13 = por %p1207_p2, %p1206_p10 }
  0x32   : > { %p1204_p12 = pneg %p1203_p9 }
  0x34   : > { %p1209_p0 = pnand %p1208_p13, %p1204_p12 }
  0x36   : > { %1212 = shalt.err (!%p1209_p0)
}
  0x37   : > { %s1213_s15 = scalar_lea.vmem %s217_s6, 256  ;;  %s1333_s16 = smov [#allocation2]  }
  0x38   : > { %p1214_p1 = scmp.ne.s32.totalorder %s217_s6, %s1213_s15  ;;  %s1218_s8 = sshll.u32 %s1333_s16, 4  ;;  %s1219_s8 = int_to_ptr.vmem [resolvable:$false] %s1218_s8 }
  0x39   : > { %s1220_s9 = scalar_lea.vmem %s1219_s8, 512  ;;  %p1221_p9 = scmp.lt.s32.totalorder %s217_s6, %s1219_s8 }
  0x3a   : > { %p1216_p6 = pnand %p1214_p1, %p1202_p7  ;;  %p1222_p3 = scmp.lt.s32.totalorder %s1220_s9, %s1213_s15 }
  0x3c   : > { %p1217_p5 = pneg %p1216_p6  ;;  %p1223_p4 = por %p1222_p3, %p1221_p9 }
  0x3e   : > { %p1224_p8 = pnand %p1223_p4, %p1217_p5 }
  0x40   : > { %1227 = shalt.err (!%p1224_p8)
}
  0x41   : > { %1072 = dma.hbm_to_vmem [thread:$0]  (!%p1465_p11), %s1462_s28, 256, %s217_s6, %s205_s11  }
  0x42   : > { %s223_s2 = sand.u32 1, %s1328_s21   ;;  %s227_s13 = scalar_lea.vmem [#allocation5], %s1457_s17 }
  0x43   : > { %s235_s12 = sshll.u32 %s227_s13, 4  ;;  %s224_s23 = scalar_lea.sflag [#allocation6], %s223_s2  ;;  %s236_s12 = int_to_ptr.vmem [resolvable:$true] %s235_s12 }
  0x44   : > { %s1228_s27 = scalar_lea.hbm %s1472_s10, 256  ;;  %s1233_s16 = scalar_lea.hbm %s1782_s1, 512 }
  0x45   : > { %p1229_p1 = scmp.ne.s32.totalorder %s1472_s10, %s1228_s27  ;;  %p1234_p8 = scmp.lt.s32.totalorder %s1472_s10, %s1782_s1 }
  0x46   : > { %p1235_p3 = scmp.lt.s32.totalorder %s1233_s16, %s1228_s27 }
  0x47   : > { %p1231_p4 = pnand %p1229_p1, %p1202_p7 }
  0x48   : > { %p1236_p12 = por %p1235_p3, %p1234_p8 }
  0x49   : > { %p1232_p6 = pneg %p1231_p4 }
  0x4b   : > { %p1237_p10 = pnand %p1236_p12, %p1232_p6 }
  0x4d   : > { %1240 = shalt.err (!%p1237_p10)
}
  0x4e   : > { %s1241_s17 = scalar_lea.vmem %s236_s12, 256  ;;  %s1334_s28 = smov [#allocation5]  }
  0x4f   : > { %p1242_p2 = scmp.ne.s32.totalorder %s236_s12, %s1241_s17  ;;  %s1246_s6 = sshll.u32 %s1334_s28, 4  ;;  %s1247_s6 = int_to_ptr.vmem [resolvable:$false] %s1246_s6 }
  0x50   : > { %s1248_s11 = scalar_lea.vmem %s1247_s6, 512  ;;  %p1249_p5 = scmp.lt.s32.totalorder %s236_s12, %s1247_s6 }
  0x51   : > { %p1244_p13 = pnand %p1242_p2, %p1202_p7  ;;  %p1250_p9 = scmp.lt.s32.totalorder %s1248_s11, %s1241_s17 }
  0x53   : > { %p1245_p0 = pneg %p1244_p13  ;;  %p1251_p1 = por %p1250_p9, %p1249_p5 }
  0x55   : > { %p1252_p4 = pnand %p1251_p1, %p1245_p0 }
  0x57   : > { %1255 = shalt.err (!%p1252_p4)
}
  0x58   : > { %1075 = dma.hbm_to_vmem [thread:$0]  (!%p1465_p11), %s1472_s10, 256, %s236_s12, %s224_s23  }
  0x59   : > { %p1801_p6 = scmp.ne.s32.totalorder %s1794_s26, 0 }
  0x5a   : > { %s1517_s2 = sand.u32 (!%p1801_p6), 1, %s1320_s19   ;;  %p1802_p7 = scmp.ne.s32.totalorder (!%p1801_p6), %s1792_s24, 0 }
  0x5b   : > { %252 = sbr.rel (%p1801_p6) target bundleno = 609 (0x261), region = 40  ;;  %s1001_s13 = sshll.u32 (!%p1801_p6), %s1517_s2, 4 }
  0x5c   : > { %s255_s27 = scalar_lea.sflag (!%p1801_p6), [#allocation3], %s1517_s2  ;;  %s1521_s29 = scalar_lea.vmem (!%p1801_p6), [#allocation2], %s1001_s13 }
  0x60   : > { %1299 = dma.done.wait (%p1802_p7), %s255_s27, 256  }
  0x61   : > { %1301 = vsyncadd (%p1802_p7), %s255_s27, 4294967040  ;;  %s263_s7 = sand.u32 1, %s1397_s22   ;;  %s1528_s10 = scalar_lea.vmem [#allocation5], %s1001_s13 }
  0x62   : > { %s264_s26 = scalar_lea.sflag [#allocation6], %s263_s7 }
  0x63   : > { %1303 = dma.done.wait (%p1802_p7), %s264_s26, 256  }
  0x64   : > { %1305 = vsyncadd (%p1802_p7), %s264_s26, 4294967040  ;;  %p1803_p11 = scmp.eq.s32.totalorder %s1397_s22, 0 }
  0x66   : > { %1307 = dma.done.wait (%p1803_p11), [#allocation6], 256   ;;  %p1804_p8 = pmov %p1803_p11 }
  0x67   : > { %v1539_v0 = vld [vmem:[%s1521_s29 + $0x8] sm:$0xff]  ;;  %v1542_v1 = vld [vmem:[%s1521_s29] sm:$0xff]  ;;  %vm541_vm0 = vcmask 1043456   ;;  %s1335_s12 = smov 91   ;;  %s1336_s24 = smov 90   ;;  %vm607_vm1 = vcmask 588800  }
  0x68   : > { %1309 = vsyncadd (%p1804_p8), [#allocation6], 4294967040  ;;  %v1545_v2 = vld [vmem:[%s1528_s10] sm:$0xff]  ;;  %516 = vrot.lane.b32.xlu0 %v1539_v0, %s1335_s12  ;;  %v1550_v3 = vcombine.high %v1542_v1, %v1542_v1  ;;  %v1553_v4 = vld [vmem:[%s1528_s10 + $0x8] sm:$0xff]  ;;  %v1567_v7 = vcombine.high %v1539_v0, %v1539_v0  ;;  %s1337_s23 = smov 92   ;;  %s1338_s15 = smov 108  }
  0x69   : > { %v1557_v5 = vcombine.low %v1553_v4, %v1553_v4  ;;  %v1579_v10 = vcombine.low %v1545_v2, %v1545_v2  ;;  %s1339_s16 = smov 109   ;;  %s1340_s8 = smov 110   ;;  %v1633_v12 = vld [vmem:[#allocation7] sm:$0xff]  ;;  %v1343_v13 = vmov 0.0   ;;  %v1344_v15 = vmov 0   ;;  %v596_v19 = vld [vmem:[%s1784_s3 + $0x8] sm:$0xff] }
  0x6a   : > { %514 = vrot.lane.b32.xlu1 %v1550_v3, %s1335_s12  ;;  %v1563_v6 = vsel %vm541_vm0, %v1550_v3, %v1545_v2  ;;  %v573_v9 = vsel %vm541_vm0, %v1567_v7, %v1553_v4  ;;  %s1341_s9 = smov 126   ;;  %s1342_s17 = smov 127   ;;  %1049 = vmatprep.mubr.msk.f32.mxu1 %vm607_vm1, %v1633_v12  ;;  %v595_v17 = vld [vmem:[%s1784_s3] sm:$0xff]  ;;  %vm586_vm2 = vcmask 736256   ;;  %vm520_vm3 = vcmask 744448  }
  0x6b   : > { %v572_v8 = vsel %vm541_vm0, %v1539_v0, %v1557_v5  ;;  %v1586_v11 = vsel %vm541_vm0, %v1542_v1, %v1579_v10  ;;  %678 = vmatprep.mubr.f32.mxu0 %v1343_v13  ;;  %1129 = vset.pattern.permute.xlu0 %v1344_v15  ;;  %vm491_vm4 = vcmask 752640   ;;  %vm462_vm5 = vcmask 883712   ;;  %p308_p3 = scmp.lt.s32.totalorder %s1397_s22, 1  ;;  %p1805_p10 = scmp.ne.s32.totalorder %s1799_s14, 0 }
  0x6c   : > { %580 = vrot.lane.b32.xlu0 %v1563_v6, %s1336_s24  ;;  %1130 = vset.pattern.permute.xlu1 %v1344_v15  ;;  %vm433_vm6 = vcmask 891904   ;;  %vm404_vm7 = vcmask 900096   ;;  %vm375_vm8 = vcmask 1031168   ;;  %vm342_vm9 = vcmask 1039360   ;;  %s1345_s28 = smov [#allocation8]  }
  0x6d   : > { %s309_s27 = scalar_select %p308_p3, %s1397_s22, 1 }
  0x6e   : > { %518 = vrot.lane.b32.xlu1 %v1567_v7, %s1335_s12  ;;  %s1260_s6 = sshll.u32 %s1345_s28, 4  ;;  %s1261_s6 = int_to_ptr.vmem [resolvable:$false] %s1260_s6 }
  0x6f   : > { %s1262_s11 = scalar_lea.vmem %s1261_s6, 768 }
  0x70   : > { %582 = vrot.lane.b32.xlu0 %v572_v8, %s1336_s24 }
  0x72   : > { %584 = vrot.lane.b32.xlu1 %v573_v9, %s1336_s24 }
  0x74   : > { %529 = vrot.lane.b32.xlu0 %v1545_v2, %s1335_s12 }
  0x76   : > { %531 = vrot.lane.b32.xlu1 %v1557_v5, %s1335_s12 }
  0x78   : > { %533 = vrot.lane.b32.xlu0 %v1553_v4, %s1335_s12 }
  0x7a   : > { %578 = vrot.lane.b32.xlu1 %v1586_v11, %s1336_s24  ;;  %s1054_s24 = smul.u32 384, %s1397_s22  ;;  %s862_s22 = scalar_lea.sflag [#allocation4], %s1517_s2 }
  0x7c   : > { %512 = vrot.lane.b32.xlu0 %v1542_v1, %s1335_s12 }
  0x7e   : > { %527 = vrot.lane.b32.xlu1 %v1579_v10, %s1335_s12  ;;  %s1052_s12 = smul.u32 24, %s1517_s2 }
  0x80   : > { %485 = vrot.lane.b32.xlu0 %v1550_v3, %s1337_s23 }
  0x82   : > { %487 = vrot.lane.b32.xlu1 %v1539_v0, %s1337_s23 }
  0x84   : > { %489 = vrot.lane.b32.xlu0 %v1567_v7, %s1337_s23 }
  0x86   : > { %500 = vrot.lane.b32.xlu1 %v1545_v2, %s1337_s23 }
  0x88   : > { %502 = vrot.lane.b32.xlu0 %v1557_v5, %s1337_s23 }
  0x8a   : > { %504 = vrot.lane.b32.xlu1 %v1553_v4, %s1337_s23 }
  0x8c   : > { %483 = vrot.lane.b32.xlu0 %v1542_v1, %s1337_s23 }
  0x8e   : > { %498 = vrot.lane.b32.xlu1 %v1579_v10, %s1337_s23  ;;  %s307_s23 = scalar_lea.vmem [#allocation8], %s1052_s12 }
  0x90   : > { %456 = vrot.lane.b32.xlu0 %v1550_v3, %s1338_s15 }
  0x92   : > { %458 = vrot.lane.b32.xlu1 %v1539_v0, %s1338_s15 }
  0x94   : > { %460 = vrot.lane.b32.xlu0 %v1567_v7, %s1338_s15 }
  0x96   : > { %471 = vrot.lane.b32.xlu1 %v1545_v2, %s1338_s15 }
  0x98   : > { %473 = vrot.lane.b32.xlu0 %v1557_v5, %s1338_s15 }
  0x9a   : > { %475 = vrot.lane.b32.xlu1 %v1553_v4, %s1338_s15 }
  0x9c   : > { %454 = vrot.lane.b32.xlu0 %v1542_v1, %s1338_s15 }
  0x9e   : > { %469 = vrot.lane.b32.xlu1 %v1579_v10, %s1338_s15  ;;  %s876_s15 = sshll.u32 %s307_s23, 4  ;;  %s877_s15 = int_to_ptr.vmem [resolvable:$true] %s876_s15 }
  0x9f   : > { %p1263_p0 = scmp.lt.s32.totalorder %s877_s15, %s1261_s6 }
  0xa0   : > { %427 = vrot.lane.b32.xlu0 %v1550_v3, %s1339_s16 }
  0xa2   : > { %429 = vrot.lane.b32.xlu1 %v1539_v0, %s1339_s16 }
  0xa4   : > { %431 = vrot.lane.b32.xlu0 %v1567_v7, %s1339_s16 }
  0xa6   : > { %442 = vrot.lane.b32.xlu1 %v1545_v2, %s1339_s16 }
  0xa8   : > { %444 = vrot.lane.b32.xlu0 %v1557_v5, %s1339_s16 }
  0xaa   : > { %446 = vrot.lane.b32.xlu1 %v1553_v4, %s1339_s16 }
  0xac   : > { %425 = vrot.lane.b32.xlu0 %v1542_v1, %s1339_s16 }
  0xae   : > { %440 = vrot.lane.b32.xlu1 %v1579_v10, %s1339_s16 }
  0xb0   : > { %398 = vrot.lane.b32.xlu0 %v1550_v3, %s1340_s8 }
  0xb2   : > { %400 = vrot.lane.b32.xlu1 %v1539_v0, %s1340_s8 }
  0xb4   : > { %402 = vrot.lane.b32.xlu0 %v1567_v7, %s1340_s8 }
  0xb6   : > { %413 = vrot.lane.b32.xlu1 %v1545_v2, %s1340_s8 }
  0xb8   : > { %415 = vrot.lane.b32.xlu0 %v1557_v5, %s1340_s8 }
  0xba   : > { %417 = vrot.lane.b32.xlu1 %v1553_v4, %s1340_s8 }
  0xbc   : > { %396 = vrot.lane.b32.xlu0 %v1542_v1, %s1340_s8 }
  0xbe   : > { %411 = vrot.lane.b32.xlu1 %v1579_v10, %s1340_s8 }
  0xc0   : > { %369 = vrot.lane.b32.xlu0 %v1550_v3, %s1341_s9 }
  0xc2   : > { %371 = vrot.lane.b32.xlu1 %v1539_v0, %s1341_s9 }
  0xc4   : > { %373 = vrot.lane.b32.xlu0 %v1567_v7, %s1341_s9 }
  0xc6   : > { %384 = vrot.lane.b32.xlu1 %v1545_v2, %s1341_s9 }
  0xc8   : > { %386 = vrot.lane.b32.xlu0 %v1557_v5, %s1341_s9 }
  0xca   : > { %388 = vrot.lane.b32.xlu1 %v1553_v4, %s1341_s9 }
  0xcc   : > { %367 = vrot.lane.b32.xlu0 %v1542_v1, %s1341_s9 }
  0xce   : > { %382 = vrot.lane.b32.xlu1 %v1579_v10, %s1341_s9  ;;  %s1743_s9 = scalar_lea.hbm %s1786_s5, %s1054_s24 }
  0xd0   : > { %336 = vrot.lane.b32.xlu0 %v1550_v3, %s1342_s17 }
  0xd2   : > { %338 = vrot.lane.b32.xlu1 %v1539_v0, %s1342_s17 }
  0xd4   : > { %340 = vrot.lane.b32.xlu0 %v1567_v7, %s1342_s17 }
  0xd6   : > { %355 = vrot.lane.b32.xlu1 %v1545_v2, %s1342_s17 }
  0xd8   : > { %357 = vrot.lane.b32.xlu0 %v1557_v5, %s1342_s17 }
  0xda   : > { %v517_v14 = vpop.permute.xlu0 %516  ;;  %359 = vrot.lane.b32.xlu1 %v1553_v4, %s1342_s17 }
  0xdc   : > { %v515_v16 = vpop.permute.xlu1 %514  ;;  %334 = vrot.lane.b32.xlu0 %v1542_v1, %s1342_s17 }
  0xdd   : > { %v522_v33 = vsel %vm520_vm3, %v515_v16, %v517_v14 }
  0xde   : > { %353 = vrot.lane.b32.xlu1 %v1579_v10, %s1342_s17  ;;  %v581_v18 = vpop.permute.xlu0 %580  ;;  %s1256_s17 = scalar_lea.vmem %s877_s15, 384 }
  0xdf   : > { %p1257_p12 = scmp.ne.s32.totalorder %s877_s15, %s1256_s17  ;;  %p1264_p5 = scmp.lt.s32.totalorder %s1262_s11, %s1256_s17 }
  0xe0   : > { %v519_v20 = vpop.permute.xlu1 %518  ;;  %599 = vperm.xlu0 %1129, %v595_v17  }
  0xe1   : > { %v523_v28 = vsel %vm520_vm3, %v517_v14, %v519_v20  ;;  %p1258_p2 = pnand %p1257_p12, %p1805_p10  ;;  %p1265_p9 = por %p1264_p5, %p1263_p0 }
  0xe2   : > { %v583_v21 = vpop.permute.xlu0 %582  ;;  %604 = vperm.xlu1 %1130, %v596_v19  }
  0xe3   : > { %v588_v22 = vsel %vm586_vm2, %v581_v18, %v583_v21  ;;  %p1259_p13 = pneg %p1258_p2 }
  0xe4   : > { %v585_v23 = vpop.permute.xlu1 %584  ;;  %628 = vmatprep.subr.mxu0 %v588_v22 }
  0xe5   : > { %v589_v24 = vsel %vm586_vm2, %v583_v21, %v585_v23  ;;  %p1266_p1 = pnand %p1265_p9, %p1259_p13 }
  0xe6   : > { %1031 = vmatprep.subr.mxu1 %v589_v24  ;;  %v530_v25 = vpop.permute.xlu0 %529 }
  0xe7   : > { %1032 = vmatpush3.msra.mxu1 %v589_v24 }
  0xe8   : > { %v532_v26 = vpop.permute.xlu1 %531 }
  0xe9   : > { %v536_v29 = vsel %vm520_vm3, %v530_v25, %v532_v26 }
  0xea   : > { %v534_v27 = vpop.permute.xlu0 %533  ;;  %v564_v36 = vsel %vm541_vm0, %v522_v33, %v536_v29 }
  0xeb   : > { %v537_v30 = vsel %vm520_vm3, %v532_v26, %v534_v27 }
  0xec   : > { %v579_v31 = vpop.permute.xlu1 %578  ;;  %v565_v32 = vsel %vm541_vm0, %v523_v28, %v537_v30 }
  0xed   : > { %1033 = vmatprep.subr.mxu1 %v565_v32  ;;  %v587_v34 = vsel %vm586_vm2, %v579_v31, %v581_v18 }
  0xee   : > { %629 = vmatpush1.msra.mxu0 %v587_v34  ;;  %1034 = vmatpush3.msra.mxu1 %v565_v32  ;;  %v513_v35 = vpop.permute.xlu0 %512 }
  0xef   : > { %630 = vmatprep.subr.mxu0 %v564_v36  ;;  %v521_v38 = vsel %vm520_vm3, %v513_v35, %v515_v16 }
  0xf0   : > { %v528_v37 = vpop.permute.xlu1 %527 }
  0xf1   : > { %v535_v39 = vsel %vm520_vm3, %v528_v37, %v530_v25 }
  0xf2   : > { %v486_v40 = vpop.permute.xlu0 %485  ;;  %v563_v41 = vsel %vm541_vm0, %v521_v38, %v535_v39 }
  0xf3   : > { %631 = vmatpush1.msra.mxu0 %v563_v41 }
  0xf4   : > { %v488_v42 = vpop.permute.xlu1 %487 }
  0xf5   : > { %v493_v46 = vsel %vm491_vm4, %v486_v40, %v488_v42 }
  0xf6   : > { %v490_v43 = vpop.permute.xlu0 %489 }
  0xf7   : > { %v494_v50 = vsel %vm491_vm4, %v488_v42, %v490_v43 }
  0xf8   : > { %v501_v44 = vpop.permute.xlu1 %500 }
  0xfa   : > { %v503_v45 = vpop.permute.xlu0 %502 }
  0xfb   : > { %v507_v47 = vsel %vm491_vm4, %v501_v44, %v503_v45 }
  0xfc   : > { %v505_v48 = vpop.permute.xlu1 %504  ;;  %v561_v49 = vsel %vm541_vm0, %v493_v46, %v507_v47 }
  0xfd   : > { %v508_v51 = vsel %vm491_vm4, %v503_v45, %v505_v48  ;;  %632 = vmatprep.subr.mxu0 %v561_v49 }
  0xfe   : > { %v484_v52 = vpop.permute.xlu0 %483  ;;  %v562_v53 = vsel %vm541_vm0, %v494_v50, %v508_v51 }
  0xff   : > { %1035 = vmatprep.subr.mxu1 %v562_v53  ;;  %v492_v55 = vsel %vm491_vm4, %v484_v52, %v486_v40 }
 0x100   : > { %v499_v54 = vpop.permute.xlu1 %498  ;;  %1036 = vmatpush3.msra.mxu1 %v562_v53 }
 0x101   : > { %v506_v56 = vsel %vm491_vm4, %v499_v54, %v501_v44 }
 0x102   : > { %v457_v57 = vpop.permute.xlu0 %456  ;;  %v560_v58 = vsel %vm541_vm0, %v492_v55, %v506_v56 }
 0x103   : > { %633 = vmatpush1.msra.mxu0 %v560_v58 }
 0x104   : > { %v459_v59 = vpop.permute.xlu1 %458 }
 0x105   : > { %v464_v63 = vsel %vm462_vm5, %v457_v57, %v459_v59 }
 0x106   : > { %v461_v60 = vpop.permute.xlu0 %460 }
 0x107   : > { %v465_v3 = vsel %vm462_vm5, %v459_v59, %v461_v60 }
 0x108   : > { %v472_v61 = vpop.permute.xlu1 %471 }
 0x10a   : > { %v474_v62 = vpop.permute.xlu0 %473 }
 0x10b   : > { %v478_v0 = vsel %vm462_vm5, %v472_v61, %v474_v62 }
 0x10c   : > { %v476_v1 = vpop.permute.xlu1 %475  ;;  %v558_v2 = vsel %vm541_vm0, %v464_v63, %v478_v0 }
 0x10d   : > { %v479_v4 = vsel %vm462_vm5, %v474_v62, %v476_v1  ;;  %634 = vmatprep.subr.mxu0 %v558_v2 }
 0x10e   : > { %v455_v5 = vpop.permute.xlu0 %454  ;;  %v559_v7 = vsel %vm541_vm0, %v465_v3, %v479_v4 }
 0x10f   : > { %1037 = vmatprep.subr.mxu1 %v559_v7  ;;  %v463_v9 = vsel %vm462_vm5, %v455_v5, %v457_v57 }
 0x110   : > { %v470_v8 = vpop.permute.xlu1 %469  ;;  %1038 = vmatpush3.msra.mxu1 %v559_v7 }
 0x111   : > { %v477_v10 = vsel %vm462_vm5, %v470_v8, %v472_v61  ;;  %v1135_v8 = vld [vmem:[%s1528_s10 + $0x8] ss:$0 sps:$4 sm:$0xff]  }
 0x112   : > { %v428_v14 = vpop.permute.xlu0 %427  ;;  %v557_v15 = vsel %vm541_vm0, %v463_v9, %v477_v10 }
 0x113   : > { %635 = vmatpush1.msra.mxu0 %v557_v15 }
 0x114   : > { %v430_v16 = vpop.permute.xlu1 %429 }
 0x115   : > { %v435_v20 = vsel %vm433_vm6, %v428_v14, %v430_v16 }
 0x116   : > { %v432_v17 = vpop.permute.xlu0 %431 }
 0x117   : > { %v436_v24 = vsel %vm433_vm6, %v430_v16, %v432_v17 }
 0x118   : > { %v443_v18 = vpop.permute.xlu1 %442 }
 0x11a   : > { %v445_v19 = vpop.permute.xlu0 %444 }
 0x11b   : > { %v449_v21 = vsel %vm433_vm6, %v443_v18, %v445_v19 }
 0x11c   : > { %v447_v22 = vpop.permute.xlu1 %446  ;;  %v555_v23 = vsel %vm541_vm0, %v435_v20, %v449_v21 }
 0x11d   : > { %v450_v25 = vsel %vm433_vm6, %v445_v19, %v447_v22  ;;  %636 = vmatprep.subr.mxu0 %v555_v23  ;;  %v594_v23 = vld [vmem:[#allocation7 + $0x8] sm:$0xff] }
 0x11e   : > { %v426_v26 = vpop.permute.xlu0 %425  ;;  %v556_v27 = vsel %vm541_vm0, %v436_v24, %v450_v25 }
 0x11f   : > { %1039 = vmatprep.subr.mxu1 %v556_v27  ;;  %v434_v29 = vsel %vm433_vm6, %v426_v26, %v428_v14  ;;  %v314_v14 = vld [vmem:[%s1521_s29 + $0x8] sm:$0xf]  ;;  %s1053_s29 = smul.u32 12, %s309_s27 }
 0x120   : > { %v441_v28 = vpop.permute.xlu1 %440  ;;  %1040 = vmatpush3.msra.mxu1 %v556_v27  ;;  %v544_v21 = vsel %vm541_vm0, %v314_v14, %v1135_v8 }
 0x121   : > { %v448_v30 = vsel %vm433_vm6, %v441_v28, %v443_v18  ;;  %s1732_s10 = scalar_lea.vmem %s1785_s4, %s1053_s29 }
 0x122   : > { %v399_v31 = vpop.permute.xlu0 %398  ;;  %v554_v32 = vsel %vm541_vm0, %v434_v29, %v448_v30 }
 0x123   : > { %637 = vmatpush1.msra.mxu0 %v554_v32 }
 0x124   : > { %v401_v33 = vpop.permute.xlu1 %400 }
 0x125   : > { %v406_v37 = vsel %vm404_vm7, %v399_v31, %v401_v33 }
 0x126   : > { %v403_v34 = vpop.permute.xlu0 %402 }
 0x127   : > { %v407_v41 = vsel %vm404_vm7, %v401_v33, %v403_v34 }
 0x128   : > { %v414_v35 = vpop.permute.xlu1 %413 }
 0x12a   : > { %v416_v36 = vpop.permute.xlu0 %415 }
 0x12b   : > { %v420_v38 = vsel %vm404_vm7, %v414_v35, %v416_v36 }
 0x12c   : > { %v418_v39 = vpop.permute.xlu1 %417  ;;  %v552_v40 = vsel %vm541_vm0, %v406_v37, %v420_v38 }
 0x12d   : > { %v421_v42 = vsel %vm404_vm7, %v416_v36, %v418_v39  ;;  %638 = vmatprep.subr.mxu0 %v552_v40 }
 0x12e   : > { %v397_v43 = vpop.permute.xlu0 %396  ;;  %v553_v44 = vsel %vm541_vm0, %v407_v41, %v421_v42 }
 0x12f   : > { %1041 = vmatprep.subr.mxu1 %v553_v44  ;;  %v405_v46 = vsel %vm404_vm7, %v397_v43, %v399_v31 }
 0x130   : > { %v412_v45 = vpop.permute.xlu1 %411  ;;  %1042 = vmatpush3.msra.mxu1 %v553_v44 }
 0x131   : > { %v419_v47 = vsel %vm404_vm7, %v412_v45, %v414_v35 }
 0x132   : > { %v370_v48 = vpop.permute.xlu0 %369  ;;  %v551_v49 = vsel %vm541_vm0, %v405_v46, %v419_v47 }
 0x133   : > { %639 = vmatpush1.msra.mxu0 %v551_v49 }
 0x134   : > { %v372_v50 = vpop.permute.xlu1 %371 }
 0x135   : > { %v377_v54 = vsel %vm375_vm8, %v370_v48, %v372_v50 }
 0x136   : > { %v374_v51 = vpop.permute.xlu0 %373 }
 0x137   : > { %v378_v58 = vsel %vm375_vm8, %v372_v50, %v374_v51  ;;  %v1136_v51 = vld [vmem:[%s1732_s10 + $0x8] ss:$0 sps:$4 sm:$0xff]  }
 0x138   : > { %v385_v52 = vpop.permute.xlu1 %384 }
 0x13a   : > { %v387_v53 = vpop.permute.xlu0 %386 }
 0x13b   : > { %v391_v55 = vsel %vm375_vm8, %v385_v52, %v387_v53 }
 0x13c   : > { %v389_v56 = vpop.permute.xlu1 %388  ;;  %v549_v57 = vsel %vm541_vm0, %v377_v54, %v391_v55 }
 0x13d   : > { %v392_v59 = vsel %vm375_vm8, %v387_v53, %v389_v56  ;;  %640 = vmatprep.subr.mxu0 %v549_v57 }
 0x13e   : > { %v368_v60 = vpop.permute.xlu0 %367  ;;  %v550_v61 = vsel %vm541_vm0, %v378_v58, %v392_v59 }
 0x13f   : > { %1043 = vmatprep.subr.mxu1 %v550_v61  ;;  %v376_v63 = vsel %vm375_vm8, %v368_v60, %v370_v48 }
 0x140   : > { %v383_v62 = vpop.permute.xlu1 %382  ;;  %1044 = vmatpush3.msra.mxu1 %v550_v61 }
 0x141   : > { %v390_v0 = vsel %vm375_vm8, %v383_v62, %v385_v52  ;;  %v805_v52 = vld [vmem:[%s1732_s10] sm:$0xff] }
 0x142   : > { %v337_v1 = vpop.permute.xlu0 %336  ;;  %v548_v2 = vsel %vm541_vm0, %v376_v63, %v390_v0  ;;  %v809_v58 = vcombine.low %v805_v52, %v805_v52 }
 0x143   : > { %641 = vmatpush1.msra.mxu0 %v548_v2 }
 0x144   : > { %v339_v3 = vpop.permute.xlu1 %338 }
 0x145   : > { %v344_v9 = vsel %vm342_vm9, %v337_v1, %v339_v3 }
 0x146   : > { %v341_v4 = vpop.permute.xlu0 %340 }
 0x147   : > { %v345_v17 = vsel %vm342_vm9, %v339_v3, %v341_v4 }
 0x148   : > { %v356_v5 = vpop.permute.xlu1 %355 }
 0x14a   : > { %v358_v7 = vpop.permute.xlu0 %357 }
 0x14b   : > { %v362_v10 = vsel %vm342_vm9, %v356_v5, %v358_v7 }
 0x14c   : > { %v360_v15 = vpop.permute.xlu1 %359  ;;  %v546_v16 = vsel %vm541_vm0, %v344_v9, %v362_v10 }
 0x14d   : > { %v363_v18 = vsel %vm342_vm9, %v358_v7, %v360_v15  ;;  %642 = vmatprep.subr.mxu0 %v546_v16 }
 0x14e   : > { %v335_v19 = vpop.permute.xlu0 %334  ;;  %v547_v20 = vsel %vm541_vm0, %v345_v17, %v363_v18 }
 0x14f   : > { %1045 = vmatprep.subr.mxu1 %v547_v20  ;;  %v343_v24 = vsel %vm342_vm9, %v335_v19, %v337_v1 }
 0x150   : > { %v354_v22 = vpop.permute.xlu1 %353  ;;  %1046 = vmatpush3.msra.mxu1 %v547_v20 }
 0x151   : > { %v361_v25 = vsel %vm342_vm9, %v354_v22, %v356_v5  ;;  %1047 = vmatprep.subr.mxu1 %v544_v21 }
 0x152   : > { %1048 = vmatpush3.msra.mxu1 %v544_v21  ;;  %v545_v26 = vsel %vm541_vm0, %v343_v24, %v361_v25 }
 0x153   : > { %643 = vmatpush1.msra.mxu0 %v545_v26  ;;  %1050 = vmatmul.mubr.msk.f32.vlgmr.msra.gmra.mxu1 %vm607_vm1, %v594_v23 }
 0x154   : > { %644 = vmatprep.subr.mxu0 %v1563_v6 }
 0x155   : > { %645 = vmatpush1.msra.mxu0 %v1586_v11 }
 0x156   : > { %1005 = vmatmul.mubr.msk.f32.vlgmr.msra.gmra.mxu0 %vm607_vm1, %v1633_v12 }
 0x157   : > { %684 = vmatprep.mubr.f32.mxu0 %v1343_v13 }
 0x15a   : > { %1006 = vmatmul.mubr.msk.f32.gmra.mxu0 %vm607_vm1, %v594_v23 }
 0x15b   : > { %v600_v28 = vpop.permute.xlu0 %599 }
 0x15d   : > { %v605_v34 = vpop.permute.xlu1 %604 }
 0x213   : > { %v1051_v27 = vpop.f32.mrf.mxu1 }
 0x214   : > { %v763_v36 = vadd.f32 %v1051_v27, %v605_v34 }
 0x215   : > { %v757_v6 = vpop.f32.mrf.mxu1 }
 0x216   : > { %v758_v29 = vadd.f32 %v757_v6, %v600_v28  ;;  %v680_v11 = vpop.f32.mrf.mxu0  ;;  %v1014_v39 = vmul.f32 -1.442695, %v763_v36 }
 0x217   : > { %v681_v30 = vadd.f32 %v680_v11, %v600_v28 }
 0x218   : > { %v1011_v31 = vmul.f32 -1.442695, %v758_v29  ;;  %v682_v12 = vpop.f32.mrf.mxu0 }
 0x219   : > { %v1009_v32 = vmul.f32 -1.442695, %v681_v30  ;;  %v683_v13 = vadd.f32 %v682_v12, %v600_v28 }
 0x21a   : > { %1138 = vpow2.f32 %v1011_v31  ;;  %v686_v35 = vpop.f32.mrf.mxu0 }
 0x21b   : > { %1140 = vpow2.f32 %v1009_v32  ;;  %v1010_v33 = vmul.f32 -1.442695, %v683_v13  ;;  %v687_v37 = vadd.f32 %v686_v35, %v605_v34 }
 0x21c   : > { %v688_v38 = vpop.f32.mrf.mxu0 }
 0x21d   : > { %1142 = vpow2.f32 %v1010_v33  ;;  %v689_v40 = vadd.f32 %v688_v38, %v605_v34  ;;  %v1012_v44 = vmul.f32 -1.442695, %v687_v37 }
 0x21e   : > { %1144 = vtanh.f32 %v687_v37 }
 0x21f   : > { %1146 = vtanh.f32 %v763_v36  ;;  %v1013_v48 = vmul.f32 -1.442695, %v689_v40 }
 0x220   : > { %1148 = vpow2.f32 %v1014_v39 }
 0x221   : > { %1150 = vtanh.f32 %v689_v40 }
 0x227   : > { %v1139_v41 = vpop.eup %1138 }
 0x228   : > { %v1141_v42 = vpop.eup %1140  ;;  %v786_v43 = vadd.f32 1.0, %v1139_v41 }
 0x229   : > { %v784_v45 = vadd.f32 1.0, %v1141_v42 }
 0x22a   : > { %v1143_v46 = vpop.eup %1142  ;;  %1152 = vrcp.f32 %v786_v43 }
 0x22b   : > { %1154 = vrcp.f32 %v784_v45  ;;  %v785_v47 = vadd.f32 1.0, %v1143_v46  ;;  %v1145_v49 = vpop.eup %1144 }
 0x22c   : > { %1156 = vpow2.f32 %v1012_v44  ;;  %v1147_v50 = vpop.eup %1146  ;;  %v819_v54 = vrot.slane %v1145_v49, 4 }
 0x22d   : > { %1158 = vrcp.f32 %v785_v47  ;;  %v1149_v53 = vpop.eup %1148  ;;  %v821_v56 = vrot.slane %v1147_v50, 4 }
 0x22e   : > { %1160 = vpow2.f32 %v1013_v48  ;;  %v1151_v55 = vpop.eup %1150  ;;  %v789_v63 = vadd.f32 1.0, %v1149_v53 }
 0x22f   : > { %v820_v1 = vrot.slane %v1151_v55, 4 }
 0x230   : > { %1162 = vrcp.f32 %v789_v63 }
 0x237   : > { %v1153_v57 = vpop.eup %1152 }
 0x238   : > { %v1155_v59 = vpop.eup %1154  ;;  %v815_v60 = vmul.f32 %v1153_v57, %v1136_v51  ;;  %v827_v61 = vmul.f32 %v1153_v57, %v821_v56 }
 0x239   : > { %v1157_v62 = vpop.eup %1156  ;;  %v825_v0 = vmul.f32 %v1155_v59, %v819_v54  ;;  %v813_v4 = vmul.f32 %v1155_v59, %v809_v58 }
 0x23a   : > { %v1159_v2 = vpop.eup %1158  ;;  %v833_v3 = vrot.slane %v827_v61, 4  ;;  %v787_v10 = vadd.f32 1.0, %v1157_v62 }
 0x23b   : > { %v831_v5 = vrot.slane %v825_v0, 4  ;;  %v826_v7 = vmul.f32 %v1159_v2, %v820_v1  ;;  %v1161_v8 = vpop.eup %1160  ;;  %v814_v15 = vmul.f32 %v1159_v2, %v805_v52 }
 0x23c   : > { %v839_v9 = vadd.f32 %v833_v3, %v815_v60  ;;  %v788_v17 = vadd.f32 1.0, %v1161_v8 }
 0x23d   : > { %v837_v14 = vadd.f32 %v831_v5, %v813_v4  ;;  %v832_v16 = vrot.slane %v826_v7, 4  ;;  %v1163_v19 = vpop.eup %1162 }
 0x23e   : > { %1164 = vtanh.f32 %v839_v9 }
 0x23f   : > { %1166 = vtanh.f32 %v837_v14  ;;  %v838_v18 = vadd.f32 %v832_v16, %v814_v15 }
 0x240   : > { %1168 = vrcp.f32 %v787_v10 }
 0x241   : > { %1170 = vtanh.f32 %v838_v18 }
 0x242   : > { %1172 = vrcp.f32 %v788_v17 }
 0x24b   : > { %v1165_v20 = vpop.eup %1164 }
 0x24c   : > { %v1167_v21 = vpop.eup %1166  ;;  %v848_v22 = vrot.slane %v1165_v20, 4 }
 0x24d   : > { %v1169_v23 = vpop.eup %1168  ;;  %v846_v24 = vrot.slane %v1167_v21, 4 }
 0x24e   : > { %v1171_v25 = vpop.eup %1170  ;;  %v854_v26 = vmul.f32 %v1163_v19, %v848_v22 }
 0x24f   : > { %v852_v27 = vmul.f32 %v1169_v23, %v846_v24  ;;  %v847_v28 = vrot.slane %v1171_v25, 4  ;;  %v1173_v6 = vpop.eup %1172 }
 0x250   : > { %v857_v29 = vsel %vm541_vm0, %v854_v26, %v839_v9 }
 0x251   : > { %v853_v11 = vmul.f32 %v1173_v6, %v847_v28  ;;  %v855_v30 = vsel %vm541_vm0, %v852_v27, %v837_v14  ;;  %860 = vst [vmem:[%s307_s23 + $0x10] sm:$0xff] %v857_v29 }
 0x252   : > { %858 = vst [vmem:[%s307_s23] sm:$0xff] %v855_v30 }
 0x253   : > { %v856_v31 = vsel %vm541_vm0, %v853_v11, %v838_v18 }
 0x254   : > { %859 = vst [vmem:[%s307_s23 + $0x8] sm:$0xff] %v856_v31 }
 0x255   : > { %1269 = shalt.err (!%p1266_p1)
}
 0x256   : > { %s1270_s13 = scalar_lea.hbm %s1743_s9, 384  ;;  %s1274_s29 = scalar_lea.hbm %s1786_s5, 768 }
 0x257   : > { %p1271_p4 = scmp.ne.s32.totalorder %s1743_s9, %s1270_s13  ;;  %p1275_p11 = scmp.lt.s32.totalorder %s1743_s9, %s1786_s5 }
 0x258   : > { %p1276_p8 = scmp.lt.s32.totalorder %s1274_s29, %s1270_s13 }
 0x259   : > { %p1272_p6 = pnand %p1271_p4, %p1805_p10 }
 0x25a   : > { %p1277_p3 = por %p1276_p8, %p1275_p11 }
 0x25b   : > { %p1273_p7 = pneg %p1272_p6 }
 0x25d   : > { %p1278_p12 = pnand %p1277_p3, %p1273_p7 }
 0x25f   : > { %1281 = shalt.err (!%p1278_p12)
}
 0x260   : > { %1063 = dma.vmem_to_hbm [thread:$0]  (%p1805_p10), %s877_s15, 384, %s1743_s9, %s862_s22  }
 0x261 PF: > { %s888_s10 = sand.u32 1, %s1316_s18   ;;  %p1806_p2 = scmp.ne.s32.totalorder %s1793_s25, 0 }
 0x262   : > { %p1807_p13 = scmp.ge.s32.totalorder %s1328_s21, 2  ;;  %s889_s12 = scalar_lea.sflag [#allocation4], %s888_s10 }
 0x264   : > { %p1077_p0 = pnand %p1807_p13, %p1806_p2 }
 0x266   : > { %p1078_p5 = pneg %p1077_p0 }
 0x268   : > { %1311 = dma.done.wait (%p1078_p5), %s889_s12, 384  }
 0x269   : > { %1313 = vsyncadd (%p1078_p5), %s889_s12, 4294966912  ;;  %s1808_s24 = sld [smem:[#allocation13_spill]]  ;;  %p21_p9 = scmp.ge.s32.totalorder %s1430_s30, 4  }
 0x26a   : > { %s1809_s18 = smov %s1320_s19  ;;  %s1810_s19 = smov %s1324_s20 }
 0x26b   : > { %s1812_s21 = smov %s1430_s30  ;;  %23 = sbr.rel (!%p21_p9) target bundleno = 9 (0x9), region = 105 }
 0x26f   : > { %s1811_s20 = smov %s1808_s24 }
 0x270   :  { %894 = vsyncpa [#allocation3], 1 }
 0x271   :  { %896 = vsyncpa [#allocation3 + $0x1], 1 }
 0x272   :  { %897 = vsyncpa [#allocation6], 1 }
 0x273   :  { %899 = vsyncpa [#allocation6 + $0x1], 1 }
 0x274   :  { %900 = vsyncpa [#allocation4], 1 }
 0x275   :  { %902 = vsyncpa [#allocation4 + $0x1], 1 }

</bundles_post_ra>
